<compile_context>
chip_gen: v6e
topology: v6e:2x2x1
jax: 0.10.0
libtpu: 0.0.40
codegen_flags: <defaults>
</compile_context>

<pallas_src>
import jax
import jax.numpy as jnp
from jax import lax
from jax.experimental import pallas as pl
from jax.experimental.pallas import tpu as pltpu

BN_EPS = 1e-3

# tap order: t=0 identity, t=1 shift-right (x[m, n+1]), t=2 shift-down (x[m+1, n]),
# t=3 shift-down-right (x[m+1, n+1]); all zero-padded on the high edge.
_TAPS = ((0, 0), (0, 1), (1, 0), (1, 1))
# (parity p = py*2+px, tap t) -> (ky, kx) of the ConvTranspose2d 3x3 kernel that contributes.
_WMAP = {
    (0, 0): (1, 1),
    (1, 0): (1, 2), (1, 1): (1, 0),
    (2, 0): (2, 1), (2, 2): (0, 1),
    (3, 0): (2, 2), (3, 1): (2, 0), (3, 2): (0, 2), (3, 3): (0, 0),
}


def _conv_stats_kernel(x_ref, w_ref, y_ref, sum_ref, sumsq_ref):
    """Pass 1: fused 4-phase conv matmul + per-tile BN partial statistics.

    x_ref:     (4*Cin, TM)     bf16, lane-dense activation tile
    w_ref:     (4*Cout, 4*Cin) bf16, block-structured transposed-conv weight
    y_ref:     (4*Cout, TM)    bf16 conv output tile (parity-major channel rows)
    sum_ref:   (4*Cout, 1)     f32 per-row partial sum   (this tile only)
    sumsq_ref: (4*Cout, 1)     f32 per-row partial sum of squares
    """
    acc = jnp.dot(w_ref[...], x_ref[...], preferred_element_type=jnp.float32)
    y_ref[...] = acc.astype(y_ref.dtype)
    # BN partials ride along while acc is still in VMEM (lane-axis reduce -> XLU slot).
    sum_ref[...] = jnp.sum(acc, axis=1, keepdims=True)
    sumsq_ref[...] = jnp.sum(acc * acc, axis=1, keepdims=True)


def _bn_relu_kernel(y_ref, scale_ref, shift_ref, o_ref):
    """Pass 2: per-channel affine (gamma*rsqrt(var+eps), beta-mean*scale) + ReLU.

    y_ref:  (Cout, TM2) bf16 conv output already in final NCHW-flat layout
    scale/shift: (Cout, 1) f32
    o_ref:  (Cout, TM2) f32 final output tile
    """
    y = y_ref[...].astype(jnp.float32)
    o_ref[...] = jnp.maximum(y * scale_ref[...] + shift_ref[...], 0.0)


def _pick_tile(hw, target):
    """Largest multiple-of-128 divisor of hw that is <= target (else full extent)."""
    if hw % 128 != 0:
        return hw
    tm = 128
    while tm * 2 <= target and hw % (tm * 2) == 0:
        tm *= 2
    return tm


def upsampler_block(x_nchw, weight, bias, gamma, beta, *, tile_target=1024):
    """x_nchw: (N, Cin, H, W); weight: (Cin, Cout, 3, 3) PyTorch ConvTranspose2d layout."""
    del bias  # per-channel constant: cancels in BN's (y - mean); see note below.
    N, Cin, H, W = x_nchw.shape
    Cout = weight.shape[1]
    HW = H * W
    C4i, C4o = 4 * Cin, 4 * Cout
    Ho, Wo = 2 * H, 2 * W
    M2 = Ho * Wo

    # ---- glue: sub-pixel (4-phase) tap views, concatenated into the K axis ----
    x_pad = jnp.pad(x_nchw, ((0, 0), (0, 0), (0, 1), (0, 1)))
    xt = jnp.stack([x_pad[:, :, dy:dy + H, dx:dx + W] for dy, dx in _TAPS], axis=1)
    xt = xt.reshape(N, C4i, HW).astype(jnp.bfloat16)   # (N, 4*Cin, H*W), M on lanes

    # block-structured weight: rows = (parity, Cout), cols = (tap, Cin)
    w_all = jnp.zeros((4, Cout, 4, Cin), jnp.float32)
    for (p, t), (ky, kx) in _WMAP.items():
        w_all = w_all.at[p, :, t, :].set(weight[:, :, ky, kx].T)
    w_all = w_all.reshape(C4o, C4i).astype(jnp.bfloat16)

    tm = _pick_tile(HW, tile_target)
    n_tiles = HW // tm
    cparams = pltpu.CompilerParams(
        dimension_semantics=("parallel", "parallel"),
        vmem_limit_bytes=32 * 1024 * 1024)   # fits v7x's 64 MiB physical VMEM comfortably

    # ---- pass 1: conv matmul (grid over (N, M-tiles)) + per-tile BN partials ----
    y, psum, psq = pl.pallas_call(
        _conv_stats_kernel,
        grid=(N, n_tiles),
        in_specs=[
            pl.BlockSpec((None, C4i, tm), lambda n, i: (n, 0, i)),
            pl.BlockSpec((C4o, C4i), lambda n, i: (0, 0)),
        ],
        out_specs=(
            pl.BlockSpec((None, C4o, tm), lambda n, i: (n, 0, i)),
            pl.BlockSpec((None, C4o, 1), lambda n, i: (n * n_tiles + i, 0, 0)),
            pl.BlockSpec((None, C4o, 1), lambda n, i: (n * n_tiles + i, 0, 0)),
        ),
        out_shape=(
            jax.ShapeDtypeStruct((N, C4o, HW), jnp.bfloat16),
            jax.ShapeDtypeStruct((N * n_tiles, C4o, 1), jnp.float32),
            jax.ShapeDtypeStruct((N * n_tiles, C4o, 1), jnp.float32),
        ),
        compiler_params=cparams,
    )(xt, w_all)

    # ---- glue: global BN statistics (training mode, biased variance), O(Cout) work ----
    count = N * Ho * Wo
    s = jnp.sum(psum, axis=(0, 2)).reshape(4, Cout).sum(axis=0)
    sq = jnp.sum(psq, axis=(0, 2)).reshape(4, Cout).sum(axis=0)
    mean = s / count
    var = sq / count - mean * mean
    # Conv bias is a per-channel constant: it cancels in (y - mean(y)) and only
    # would matter for running-stat updates (not modeled).
    scale = (gamma * lax.rsqrt(var + BN_EPS)).reshape(Cout, 1).astype(jnp.float32)
    shift = (beta - mean.reshape(-1) * scale.reshape(-1)).reshape(Cout, 1).astype(jnp.float32)

    # ---- glue: parity interleave to final NCHW layout while still in bf16 ----
    # y: (N, 4*Cout, HW) with rows = (py, px, Cout); -> (N, Cout, H, 2, W, 2) -> flat M2.
    y_t = y.reshape(N, 2, 2, Cout, H, W)
    y_t = jnp.transpose(y_t, (0, 3, 4, 1, 5, 2)).reshape(N, Cout, M2)

    # ---- pass 2: fused affine normalize + ReLU; writes final-layout f32 directly ----
    tm2 = _pick_tile(M2, 2 * tile_target)
    n_tiles2 = M2 // tm2
    out_flat = pl.pallas_call(
        _bn_relu_kernel,
        grid=(N, n_tiles2),
        in_specs=[
            pl.BlockSpec((None, Cout, tm2), lambda n, i: (n, 0, i)),
            pl.BlockSpec((Cout, 1), lambda n, i: (0, 0)),
            pl.BlockSpec((Cout, 1), lambda n, i: (0, 0)),
        ],
        out_specs=pl.BlockSpec((None, Cout, tm2), lambda n, i: (n, 0, i)),
        out_shape=jax.ShapeDtypeStruct((N, Cout, M2), jnp.float32),
        compiler_params=cparams,
    )(y_t, scale, shift)

    return out_flat.reshape(N, Cout, Ho, Wo)


def upsampler_block_ref(x_nchw, weight, bias, gamma, beta):
    """Pure-JAX reference (same PyTorch semantics), used as a correctness check."""
    Cout = weight.shape[1]
    w_conv = jnp.transpose(weight[:, :, ::-1, ::-1], (1, 0, 2, 3))  # (Cout, Cin, 3, 3)
    y = lax.conv_general_dilated(
        x_nchw, w_conv, window_strides=(1, 1),
        padding=((1, 2), (1, 2)), lhs_dilation=(2, 2),
        dimension_numbers=("NCHW", "OIHW", "NCHW"),
        precision=lax.Precision.HIGHEST)
    y = y + bias.reshape(1, Cout, 1, 1)
    mean = jnp.mean(y, axis=(0, 2, 3), keepdims=True)
    var = jnp.mean((y - mean) ** 2, axis=(0, 2, 3), keepdims=True)
    y = (y - mean) * lax.rsqrt(var + BN_EPS) * gamma.reshape(1, Cout, 1, 1) \
        + beta.reshape(1, Cout, 1, 1)
    return jnp.maximum(y, 0.0)


if __name__ == "__main__":
    N, Cin, H, W = 2, 4, 16, 16
    Cout = 8

    key = jax.random.PRNGKey(0)
    k1, k2, k3, k4, k5 = jax.random.split(key, 5)
    x = jax.random.normal(k1, (N, Cin, H, W), jnp.float32)
    weight = 0.1 * jax.random.normal(k2, (Cin, Cout, 3, 3), jnp.float32)   # ConvTranspose2d.weight
    bias = 0.1 * jax.random.normal(k3, (Cout,), jnp.float32)               # ConvTranspose2d.bias
    gamma = 1.0 + 0.1 * jax.random.normal(k4, (Cout,), jnp.float32)        # bn.weight
    beta = 0.1 * jax.random.normal(k5, (Cout,), jnp.float32)               # bn.bias

    fn = jax.jit(upsampler_block)
    out = jax.block_until_ready(fn(x, weight, bias, gamma, beta))
    ref = jax.block_until_ready(upsampler_block_ref(x, weight, bias, gamma, beta))

    assert out.shape == (N, Cout, 2 * H, 2 * W), out.shape
    max_err = float(jnp.max(jnp.abs(out - ref)))
    assert jnp.allclose(out, ref, atol=3e-2, rtol=3e-2), max_err   # bf16 matmul/intermediate tolerance
    print("KERNEL_OK")
</pallas_src>

<mosaic_0001>
module attributes {stable_mosaic.version = 11 : i64} {
  func.func @_conv_stats_kernel(%arg0: i32, %arg1: i32, %arg2: memref<1x16x256xbf16, #tpu.memory_space<vmem>>, %arg3: memref<32x16xbf16, #tpu.memory_space<vmem>>, %arg4: memref<1x32x256xbf16, #tpu.memory_space<vmem>>, %arg5: memref<1x32x1xf32, #tpu.memory_space<vmem>>, %arg6: memref<1x32x1xf32, #tpu.memory_space<vmem>>) attributes {dimension_semantics = [#tpu.dimension_semantics<parallel>, #tpu.dimension_semantics<parallel>], iteration_bounds = array<i64: 2, 1>, scalar_prefetch = 0 : i64, scratch_operands = 0 : i64, tpu.core_type = #tpu.core_type<tc>, window_params = [{transform_indices = @transform_0, window_bounds = array<i64: 1, 16, 256>}, {pipeline_mode = #tpu.pipeline_mode<synchronous>, transform_indices = @transform_1, window_bounds = array<i64: 32, 16>}, {transform_indices = @transform_2, window_bounds = array<i64: 1, 32, 256>}, {transform_indices = @transform_3, window_bounds = array<i64: 1, 32, 1>}, {transform_indices = @transform_4, window_bounds = array<i64: 1, 32, 1>}]} {
    %c0 = arith.constant 0 : index
    %c0_0 = arith.constant 0 : index
    %0 = vector.load %arg3[%c0, %c0_0] : memref<32x16xbf16, #tpu.memory_space<vmem>>, vector<32x16xbf16>
    %c0_1 = arith.constant 0 : index
    %c0_2 = arith.constant 0 : index
    %c0_3 = arith.constant 0 : index
    %1 = vector.load %arg2[%c0_1, %c0_2, %c0_3] : memref<1x16x256xbf16, #tpu.memory_space<vmem>>, vector<1x16x256xbf16>
    %2 = vector.shape_cast %1 : vector<1x16x256xbf16> to vector<16x256xbf16>
    %cst = arith.constant dense<0.000000e+00> : vector<32x256xf32>
    %3 = tpu.matmul %0, %2, %cst {dimension_numbers = #tpu.dot_dimension_numbers<[1], [0], [0], [1], [0, 0, 1, 1], [], []>} : vector<32x16xbf16>, vector<16x256xbf16>, vector<32x256xf32> -> vector<32x256xf32>
    %4 = arith.truncf %3 : vector<32x256xf32> to vector<32x256xbf16>
    %c0_4 = arith.constant 0 : index
    %c0_5 = arith.constant 0 : index
    %c0_6 = arith.constant 0 : index
    %5 = vector.load %arg4[%c0_4, %c0_5, %c0_6] : memref<1x32x256xbf16, #tpu.memory_space<vmem>>, vector<1x32x256xbf16>
    %6 = vector.shape_cast %5 : vector<1x32x256xbf16> to vector<32x256xbf16>
    %7 = vector.shape_cast %4 : vector<32x256xbf16> to vector<1x32x256xbf16>
    tpu.vector_store %arg4[%c0_4, %c0_5, %c0_6], %7 {strides = array<i32>} : memref<1x32x256xbf16, #tpu.memory_space<vmem>>, vector<1x32x256xbf16>,
    %cst_7 = arith.constant dense<0.000000e+00> : vector<32xf32>
    %8 = vector.multi_reduction <add>, %3, %cst_7 [1] : vector<32x256xf32> to vector<32xf32>
    %9 = vector.shape_cast %8 : vector<32xf32> to vector<32x1xf32>
    %c0_8 = arith.constant 0 : index
    %c0_9 = arith.constant 0 : index
    %c0_10 = arith.constant 0 : index
    %10 = vector.load %arg5[%c0_8, %c0_9, %c0_10] : memref<1x32x1xf32, #tpu.memory_space<vmem>>, vector<1x32x1xf32>
    %11 = vector.shape_cast %10 : vector<1x32x1xf32> to vector<32x1xf32>
    %12 = vector.shape_cast %9 : vector<32x1xf32> to vector<1x32x1xf32>
    tpu.vector_store %arg5[%c0_8, %c0_9, %c0_10], %12 {strides = array<i32>} : memref<1x32x1xf32, #tpu.memory_space<vmem>>, vector<1x32x1xf32>,
    %13 = arith.mulf %3, %3 : vector<32x256xf32>
    %cst_11 = arith.constant dense<0.000000e+00> : vector<32xf32>
    %14 = vector.multi_reduction <add>, %13, %cst_11 [1] : vector<32x256xf32> to vector<32xf32>
    %15 = vector.shape_cast %14 : vector<32xf32> to vector<32x1xf32>
    %c0_12 = arith.constant 0 : index
    %c0_13 = arith.constant 0 : index
    %c0_14 = arith.constant 0 : index
    %16 = vector.load %arg6[%c0_12, %c0_13, %c0_14] : memref<1x32x1xf32, #tpu.memory_space<vmem>>, vector<1x32x1xf32>
    %17 = vector.shape_cast %16 : vector<1x32x1xf32> to vector<32x1xf32>
    %18 = vector.shape_cast %15 : vector<32x1xf32> to vector<1x32x1xf32>
    tpu.vector_store %arg6[%c0_12, %c0_13, %c0_14], %18 {strides = array<i32>} : memref<1x32x1xf32, #tpu.memory_space<vmem>>, vector<1x32x1xf32>,
    return
  }
  func.func @transform_0(%arg0: i32, %arg1: i32) -> (i32, i32, i32) {
    %c0_i32 = arith.constant 0 : i32
    %c0_i32_0 = arith.constant 0 : i32
    return %arg0, %c0_i32, %arg1 : i32, i32, i32
  }
  func.func @transform_1(%arg0: i32, %arg1: i32) -> (i32, i32) {
    %c0_i32 = arith.constant 0 : i32
    %c0_i32_0 = arith.constant 0 : i32
    %c0_i32_1 = arith.constant 0 : i32
    return %c0_i32, %c0_i32_0 : i32, i32
  }
  func.func @transform_2(%arg0: i32, %arg1: i32) -> (i32, i32, i32) {
    %c0_i32 = arith.constant 0 : i32
    %c0_i32_0 = arith.constant 0 : i32
    return %arg0, %c0_i32, %arg1 : i32, i32, i32
  }
  func.func @transform_3(%arg0: i32, %arg1: i32) -> (i32, i32, i32) {
    %c1_i32 = arith.constant 1 : i32
    %0 = arith.muli %arg0, %c1_i32 : i32
    %1 = arith.addi %0, %arg1 : i32
    %c0_i32 = arith.constant 0 : i32
    %c0_i32_0 = arith.constant 0 : i32
    %c0_i32_1 = arith.constant 0 : i32
    return %1, %c0_i32, %c0_i32_0 : i32, i32, i32
  }
  func.func @transform_4(%arg0: i32, %arg1: i32) -> (i32, i32, i32) {
    %c1_i32 = arith.constant 1 : i32
    %0 = arith.muli %arg0, %c1_i32 : i32
    %1 = arith.addi %0, %arg1 : i32
    %c0_i32 = arith.constant 0 : i32
    %c0_i32_0 = arith.constant 0 : i32
    %c0_i32_1 = arith.constant 0 : i32
    return %1, %c0_i32, %c0_i32_0 : i32, i32, i32
  }
}

module attributes {stable_mosaic.version = 11 : i64} {
  func.func @_bn_relu_kernel(%arg0: i32, %arg1: i32, %arg2: memref<1x8x1024xbf16, #tpu.memory_space<vmem>>, %arg3: memref<8x1xf32, #tpu.memory_space<vmem>>, %arg4: memref<8x1xf32, #tpu.memory_space<vmem>>, %arg5: memref<1x8x1024xf32, #tpu.memory_space<vmem>>) attributes {dimension_semantics = [#tpu.dimension_semantics<parallel>, #tpu.dimension_semantics<parallel>], iteration_bounds = array<i64: 2, 1>, scalar_prefetch = 0 : i64, scratch_operands = 0 : i64, tpu.core_type = #tpu.core_type<tc>, window_params = [{transform_indices = @transform_0, window_bounds = array<i64: 1, 8, 1024>}, {pipeline_mode = #tpu.pipeline_mode<synchronous>, transform_indices = @transform_1, window_bounds = array<i64: 8, 1>}, {pipeline_mode = #tpu.pipeline_mode<synchronous>, transform_indices = @transform_2, window_bounds = array<i64: 8, 1>}, {transform_indices = @transform_3, window_bounds = array<i64: 1, 8, 1024>}]} {
    %c0 = arith.constant 0 : index
    %c0_0 = arith.constant 0 : index
    %c0_1 = arith.constant 0 : index
    %0 = vector.load %arg2[%c0, %c0_0, %c0_1] : memref<1x8x1024xbf16, #tpu.memory_space<vmem>>, vector<1x8x1024xbf16>
    %1 = vector.shape_cast %0 : vector<1x8x1024xbf16> to vector<8x1024xbf16>
    %2 = arith.extf %1 : vector<8x1024xbf16> to vector<8x1024xf32>
    %c0_2 = arith.constant 0 : index
    %c0_3 = arith.constant 0 : index
    %3 = vector.load %arg3[%c0_2, %c0_3] : memref<8x1xf32, #tpu.memory_space<vmem>>, vector<8x1xf32>
    %4 = vector.broadcast %3 : vector<8x1xf32> to vector<8x1024xf32>
    %5 = arith.mulf %2, %4 : vector<8x1024xf32>
    %c0_4 = arith.constant 0 : index
    %c0_5 = arith.constant 0 : index
    %6 = vector.load %arg4[%c0_4, %c0_5] : memref<8x1xf32, #tpu.memory_space<vmem>>, vector<8x1xf32>
    %7 = vector.broadcast %6 : vector<8x1xf32> to vector<8x1024xf32>
    %8 = arith.addf %5, %7 : vector<8x1024xf32>
    %cst = arith.constant 0.000000e+00 : f32
    %9 = vector.broadcast %cst : f32 to vector<8x1024xf32>
    %10 = arith.maximumf %8, %9 : vector<8x1024xf32>
    %c0_6 = arith.constant 0 : index
    %c0_7 = arith.constant 0 : index
    %c0_8 = arith.constant 0 : index
    %11 = vector.load %arg5[%c0_6, %c0_7, %c0_8] : memref<1x8x1024xf32, #tpu.memory_space<vmem>>, vector<1x8x1024xf32>
    %12 = vector.shape_cast %11 : vector<1x8x1024xf32> to vector<8x1024xf32>
    %13 = vector.shape_cast %10 : vector<8x1024xf32> to vector<1x8x1024xf32>
    tpu.vector_store %arg5[%c0_6, %c0_7, %c0_8], %13 {strides = array<i32>} : memref<1x8x1024xf32, #tpu.memory_space<vmem>>, vector<1x8x1024xf32>,
    return
  }
  func.func @transform_0(%arg0: i32, %arg1: i32) -> (i32, i32, i32) {
    %c0_i32 = arith.constant 0 : i32
    %c0_i32_0 = arith.constant 0 : i32
    return %arg0, %c0_i32, %arg1 : i32, i32, i32
  }
  func.func @transform_1(%arg0: i32, %arg1: i32) -> (i32, i32) {
    %c0_i32 = arith.constant 0 : i32
    %c0_i32_0 = arith.constant 0 : i32
    %c0_i32_1 = arith.constant 0 : i32
    return %c0_i32, %c0_i32_0 : i32, i32
  }
  func.func @transform_2(%arg0: i32, %arg1: i32) -> (i32, i32) {
    %c0_i32 = arith.constant 0 : i32
    %c0_i32_0 = arith.constant 0 : i32
    %c0_i32_1 = arith.constant 0 : i32
    return %c0_i32, %c0_i32_0 : i32, i32
  }
  func.func @transform_3(%arg0: i32, %arg1: i32) -> (i32, i32, i32) {
    %c0_i32 = arith.constant 0 : i32
    %c0_i32_0 = arith.constant 0 : i32
    return %arg0, %c0_i32, %arg1 : i32, i32, i32
  }
}

</mosaic_0001>

<bundles_post_ra>
// kernel: upsampler_block.2
= control target key start
LH: loop header
LB: loop body
LE: loop exit
PB: predicated region body
PF: predicated region fallthrough
CT: control target
= control target key end

     0   :  { %s702_s15 = smov 0   ;;  %s704_s16 = smov 0   ;;  %s760_s0 = inlined_call_operand.vmem [shape: bf16[2,16,256], index: 0, kind: input, shape index: {}]   ;;  %s761_s1 = inlined_call_operand.vmem [shape: bf16[32,16], index: 1, kind: input, shape index: {}]   ;;  %s762_s2 = inlined_call_operand.vmem [shape: bf16[2,32,256], index: 2, kind: output, shape index: {0}]   ;;  %s763_s3 = inlined_call_operand.vmem [shape: f32[2,32,1], index: 3, kind: output, shape index: {1}]   ;;  %s764_s4 = inlined_call_operand.vmem [shape: f32[2,32,1], index: 4, kind: output, shape index: {2}]  }
   0x1   :  { %s706_s17 = smov 0  }
   0x2 LB: > { %s27_s18 = sadd.s32 1, %s670_s16  ;;  %p591_p0 = scmp.ge.s32.totalorder %s674_s17, 1  ;;  %s674_s17 = sphi %s706_s17, %s15_s17   ;;  %s670_s16 = sphi %s704_s16, %s766_s16   ;;  %s666_s15 = sphi %s702_s15, %s765_s15  }
   0x3   : > { %p29_p1 = scmp.ge.s32.totalorder %s27_s18, 2  ;;  %p192_p2 = scmp.lt.s32.totalorder %s674_s17, 3 }
   0x5   : > { %s768_s18 = smov (%p29_p1, %s27_s18), 0  ;;  %p193_p3 = pnand %p591_p0, %p192_p2 }
   0x6   : > { %p239_p4 = scmp.lt.s32.totalorder (!%p193_p3), %s666_s15, 1 }
   0x7   : > { %196 = sbr.rel (%p193_p3) target bundleno = 368 (0x170), region = 28 }
   0xc   : > { %v676_v0 = vmov 0   ;;  %s770_s15 = smov (!%p239_p4, %s666_s15), 1  ;;  %v650_v3 = vld [vmem:[%s761_s1] sm:$0xff]   ;;  %v651_v4 = vld [vmem:[%s761_s1 + $0x8] sm:$0xff]   ;;  %vm299_vm0 = vcmask 130048   ;;  %vm399_vm1 = vcmask 7168  }
   0xd   : > { %338 = vmatprep.mubr.bf16.mxu0 %v676_v0  ;;  %348 = vmatprep.mubr.bf16.mxu1 %v676_v0  ;;  %s612_s19 = sshll.u32 %s770_s15, 4  ;;  %s729_s27 = sshll.u32 %s770_s15, 5 }
   0xe   : > { %s246_s22 = scalar_lea.vmem %s760_s0, %s612_s19  ;;  %s256_s30 = scalar_lea.vmem %s762_s2, %s729_s27 }
   0xf   : > { %v647_v1 = vld [vmem:[%s246_s22 + $0x4] ss:$8 sps:$4 sm:$0xff]   ;;  %v649_v2 = vld [vmem:[%s246_s22] ss:$8 sps:$4 sm:$0xff]   ;;  %s263_s7 = scalar_lea.vmem %s763_s3, %s729_s27  ;;  %s270_s10 = scalar_lea.vmem %s764_s4, %s729_s27 }
  0x10   : > { %320 = vmatprep.subr.bf16.mxu0 %v647_v1  ;;  %620 = vmatprep.subr.bf16.mxu1 %v647_v1 }
  0x11   : > { %321 = vmatpush1.bf16.msra.mxu0 %v649_v2  ;;  %621 = vmatpush1.bf16.msra.mxu1 %v649_v2 }
  0x14   : > { %604 = vmatmul.mubr.msk.bf16.vlgmr.msra.gmra.mxu0 %vm299_vm0, %v650_v3  ;;  %605 = vmatmul.mubr.msk.bf16.vlgmr.msra.gmra.mxu1 %vm299_vm0, %v651_v4 }
  0xd4   : > { %v340_v5 = vpop.f32.mrf.mxu0  ;;  %v350_v6 = vpop.f32.mrf.mxu1 }
  0xd5   : > { %v404_v16 = vmul.f32 %v340_v5, %v340_v5  ;;  %v408_v29 = vmul.f32 %v350_v6, %v350_v6 }
  0xd6   : > { %v342_v7 = vpop.f32.mrf.mxu0  ;;  %v352_v8 = vpop.f32.mrf.mxu1 }
  0xd7   : > { %v616_v9 = vpack.c.bf16 %v342_v7, %v340_v5  ;;  %v618_v10 = vpack.c.bf16 %v352_v8, %v350_v6  ;;  %v393_v11 = vadd.f32 %v352_v8, %v350_v6  ;;  %v387_v12 = vadd.f32 %v342_v7, %v340_v5 }
  0xd8   : > { %v344_v13 = vpop.f32.mrf.mxu0  ;;  %v354_v14 = vpop.f32.mrf.mxu1  ;;  %v405_v15 = vmul.f32 %v342_v7, %v342_v7  ;;  %v409_v26 = vmul.f32 %v352_v8, %v352_v8 }
  0xd9   : > { %383 = vst [vmem:[%s256_s30] sm:$0xff] %v616_v9  ;;  %385 = vst [vmem:[%s256_s30 + $0x10] sm:$0xff] %v618_v10  ;;  %394 = vadd.xlane.f32.xlu1 %v393_v11  ;;  %388 = vadd.xlane.f32.xlu0 %v387_v12  ;;  %v406_v24 = vmul.f32 %v344_v13, %v344_v13  ;;  %v410_v30 = vmul.f32 %v354_v14, %v354_v14 }
  0xda   : > { %v346_v17 = vpop.f32.mrf.mxu0  ;;  %v356_v18 = vpop.f32.mrf.mxu1  ;;  %v412_v21 = vadd.f32 %v405_v15, %v404_v16  ;;  %v418_v31 = vadd.f32 %v409_v26, %v408_v29 }
  0xdb   : > { %v617_v19 = vpack.c.bf16 %v346_v17, %v344_v13  ;;  %v619_v20 = vpack.c.bf16 %v356_v18, %v354_v14  ;;  %v407_v22 = vmul.f32 %v346_v17, %v346_v17  ;;  %v396_v23 = vadd.f32 %v356_v18, %v354_v14 }
  0xdc   : > { %v390_v25 = vadd.f32 %v346_v17, %v344_v13  ;;  %v411_v27 = vmul.f32 %v356_v18, %v356_v18 }
  0xdd   : > { %384 = vst [vmem:[%s256_s30 + $0x8] sm:$0xff] %v617_v19  ;;  %386 = vst [vmem:[%s256_s30 + $0x18] sm:$0xff] %v619_v20  ;;  %413 = vadd.xlane.f32.xlu0 %v412_v21  ;;  %397 = vadd.xlane.f32.xlu1 %v396_v23  ;;  %v415_v28 = vadd.f32 %v407_v22, %v406_v24 }
  0xde   : > { %v421_v32 = vadd.f32 %v411_v27, %v410_v30 }
  0xe1   : > { %391 = vadd.xlane.f32.xlu0 %v390_v25  ;;  %416 = vadd.xlane.f32.xlu1 %v415_v28 }
  0xe5   : > { %419 = vadd.xlane.f32.xlu0 %v418_v31  ;;  %422 = vadd.xlane.f32.xlu1 %v421_v32 }
 0x162   : > { %v395_v33 = vpop.xlane.xlu1 %394  ;;  %v389_v34 = vpop.xlane.xlu0 %388 }
 0x163   : > { %402 = vst.msk [vmem:[%s263_s7 + $0x10] sm:$0xff] %vm399_vm1, %v395_v33  ;;  %400 = vst.msk [vmem:[%s263_s7] sm:$0xff] %vm399_vm1, %v389_v34 }
 0x166   : > { %v414_v35 = vpop.xlane.xlu0 %413  ;;  %v398_v36 = vpop.xlane.xlu1 %397 }
 0x167   : > { %424 = vst.msk [vmem:[%s270_s10] sm:$0xff] %vm399_vm1, %v414_v35  ;;  %403 = vst.msk [vmem:[%s263_s7 + $0x18] sm:$0xff] %vm399_vm1, %v398_v36 }
 0x16a   : > { %v392_v37 = vpop.xlane.xlu0 %391  ;;  %v417_v38 = vpop.xlane.xlu1 %416 }
 0x16b   : > { %401 = vst.msk [vmem:[%s263_s7 + $0x8] sm:$0xff] %vm399_vm1, %v392_v37  ;;  %425 = vst.msk [vmem:[%s270_s10 + $0x8] sm:$0xff] %vm399_vm1, %v417_v38 }
 0x16e   : > { %v420_v39 = vpop.xlane.xlu0 %419  ;;  %v423_v40 = vpop.xlane.xlu1 %422 }
 0x16f   : > { %426 = vst.msk [vmem:[%s270_s10 + $0x10] sm:$0xff] %vm399_vm1, %v420_v39  ;;  %427 = vst.msk [vmem:[%s270_s10 + $0x18] sm:$0xff] %vm399_vm1, %v423_v40 }
 0x170 PF: > { %s15_s17 = sadd.s32 1, %s674_s17   ;;  %s765_s15 = smov %s670_s16 }
 0x171   : > { %p12_p5 = scmp.ge.s32.totalorder %s15_s17, 4   ;;  %s766_s16 = smov %s768_s18 }
 0x173   :  { %14 = sbr.rel (!%p12_p5) target bundleno = 2 (0x2), region = 82 }

// kernel: upsampler_block.3
= control target key start
LH: loop header
LB: loop body
LE: loop exit
PB: predicated region body
PF: predicated region fallthrough
CT: control target
= control target key end

     0   :  { %s437_s12 = smov 0   ;;  %s439_s13 = smov 0   ;;  %s480_s0 = inlined_call_operand.vmem [shape: bf16[2,8,1024], index: 0, kind: input, shape index: {}]   ;;  %s481_s1 = inlined_call_operand.vmem [shape: f32[8,1], index: 1, kind: input, shape index: {}]   ;;  %s482_s2 = inlined_call_operand.vmem [shape: f32[8,1], index: 2, kind: input, shape index: {}]   ;;  %s483_s3 = inlined_call_operand.vmem [shape: f32[2,8,1024], index: 3, kind: output, shape index: {}]  }
   0x1   :  { %s441_s14 = smov 0  }
   0x2 LB: > { %s25_s15 = sadd.s32 1, %s410_s13  ;;  %p357_p0 = scmp.ge.s32.totalorder %s414_s14, 1  ;;  %s414_s14 = sphi %s441_s14, %s13_s14   ;;  %s410_s13 = sphi %s439_s13, %s485_s13   ;;  %s406_s12 = sphi %s437_s12, %s484_s12  }
   0x3   : > { %p27_p1 = scmp.ge.s32.totalorder %s25_s15, 2  ;;  %p158_p2 = scmp.lt.s32.totalorder %s414_s14, 3 }
   0x5   : > { %s487_s15 = smov (%p27_p1, %s25_s15), 0  ;;  %p159_p3 = pnand %p357_p0, %p158_p2 }
   0x6   : > { %p191_p4 = scmp.lt.s32.totalorder (!%p159_p3), %s406_s12, 1 }
   0x7   : > { %162 = sbr.rel (%p159_p3) target bundleno = 150 (0x96), region = 32 }
   0xc   : > { %v222_v0 = vld [vmem:[%s481_s1] sm:$0xff]  ;;  %v416_v1 = vmov 0   ;;  %s489_s12 = smov (!%p191_p4, %s406_s12), 1 }
   0xd   : > { %391 = vset.pattern.permute.xlu0 %v416_v1  ;;  %v236_v2 = vld [vmem:[%s482_s2] sm:$0xff]  ;;  %s364_s20 = sshll.u32 %s489_s12, 5  ;;  %s365_s24 = sshll.u32 %s489_s12, 6 }
   0xe   : > { %225 = vperm.xlu0 %391, %v222_v0   ;;  %s198_s23 = scalar_lea.vmem %s480_s0, %s364_s20  ;;  %s208_s27 = scalar_lea.vmem %s483_s3, %s365_s24 }
   0xf   : > { %v210_v3 = vld [vmem:[%s198_s23] sm:$0xff]  ;;  %v211_v4 = vld [vmem:[%s198_s23 + $0x8] sm:$0xff]  ;;  %v212_v5 = vld [vmem:[%s198_s23 + $0x10] sm:$0xff] }
  0x10   : > { %v213_v6 = vld [vmem:[%s198_s23 + $0x18] sm:$0xff]  ;;  %v214_v7 = vunpack.c.l.bf16 %v210_v3  ;;  %v215_v8 = vunpack.c.h.bf16 %v210_v3  ;;  %v216_v9 = vunpack.c.l.bf16 %v211_v4  ;;  %v217_v10 = vunpack.c.h.bf16 %v211_v4 }
  0x11   : > { %v218_v12 = vunpack.c.l.bf16 %v212_v5  ;;  %v219_v13 = vunpack.c.h.bf16 %v212_v5  ;;  %v220_v14 = vunpack.c.l.bf16 %v213_v6  ;;  %v221_v15 = vunpack.c.h.bf16 %v213_v6 }
  0x12   : > { %239 = vperm.xlu0 %391, %v236_v2  }
  0x89   : > { %v226_v11 = vpop.permute.xlu0 %225 }
  0x8a   : > { %v228_v16 = vmul.f32 %v226_v11, %v214_v7  ;;  %v229_v17 = vmul.f32 %v226_v11, %v215_v8  ;;  %v230_v18 = vmul.f32 %v226_v11, %v216_v9  ;;  %v231_v19 = vmul.f32 %v226_v11, %v217_v10 }
  0x8b   : > { %v232_v21 = vmul.f32 %v226_v11, %v218_v12  ;;  %v233_v22 = vmul.f32 %v226_v11, %v219_v13  ;;  %v234_v23 = vmul.f32 %v226_v11, %v220_v14  ;;  %v235_v24 = vmul.f32 %v226_v11, %v221_v15 }
  0x8d   : > { %v240_v20 = vpop.permute.xlu0 %239 }
  0x8e   : > { %v242_v25 = vadd.f32 %v240_v20, %v228_v16  ;;  %v243_v26 = vadd.f32 %v240_v20, %v229_v17  ;;  %v244_v27 = vadd.f32 %v240_v20, %v230_v18  ;;  %v245_v28 = vadd.f32 %v240_v20, %v231_v19 }
  0x8f   : > { %v246_v29 = vadd.f32 %v240_v20, %v232_v21  ;;  %v247_v30 = vadd.f32 %v240_v20, %v233_v22  ;;  %v248_v31 = vadd.f32 %v240_v20, %v234_v23  ;;  %v249_v32 = vadd.f32 %v240_v20, %v235_v24 }
  0x90   : > { %v250_v33 = vmax.f32 %v242_v25, 0.0  ;;  %v251_v34 = vmax.f32 %v243_v26, 0.0  ;;  %v252_v35 = vmax.f32 %v244_v27, 0.0  ;;  %v253_v36 = vmax.f32 %v245_v28, 0.0 }
  0x91   : > { %v254_v37 = vmax.f32 %v246_v29, 0.0  ;;  %v255_v38 = vmax.f32 %v247_v30, 0.0  ;;  %v256_v39 = vmax.f32 %v248_v31, 0.0  ;;  %v257_v40 = vmax.f32 %v249_v32, 0.0 }
  0x92   : > { %258 = vst [vmem:[%s208_s27] sm:$0xff] %v250_v33  ;;  %259 = vst [vmem:[%s208_s27 + $0x8] sm:$0xff] %v251_v34 }
  0x93   : > { %260 = vst [vmem:[%s208_s27 + $0x10] sm:$0xff] %v252_v35  ;;  %261 = vst [vmem:[%s208_s27 + $0x18] sm:$0xff] %v253_v36 }
  0x94   : > { %262 = vst [vmem:[%s208_s27 + $0x20] sm:$0xff] %v254_v37  ;;  %263 = vst [vmem:[%s208_s27 + $0x28] sm:$0xff] %v255_v38 }
  0x95   : > { %264 = vst [vmem:[%s208_s27 + $0x30] sm:$0xff] %v256_v39  ;;  %265 = vst [vmem:[%s208_s27 + $0x38] sm:$0xff] %v257_v40 }
  0x96 PF: > { %s13_s14 = sadd.s32 1, %s414_s14   ;;  %s484_s12 = smov %s410_s13 }
  0x97   : > { %p10_p5 = scmp.ge.s32.totalorder %s13_s14, 4   ;;  %s485_s13 = smov %s487_s15 }
  0x99   :  { %12 = sbr.rel (!%p10_p5) target bundleno = 2 (0x2), region = 62 }

</bundles_post_ra>
